<compile_context>
chip_gen: v7x
topology: tpu7x:2x2x1
jax: 0.10.0
libtpu: 0.0.40
codegen_flags: <defaults>
</compile_context>

<pallas_src>
import functools
import math

import jax
import jax.numpy as jnp
import numpy as np
from jax.experimental import pallas as pl
from jax.experimental.pallas import tpu as pltpu


# -----------------------------------------------------------------------------
# Pass 1 kernel: conv tile (one fused MXU matmul) + streaming BN partial stats.
# -----------------------------------------------------------------------------
def _conv_stats_kernel(x_ref, hl_ref, hr_ref, w_ref, y_ref, ps_ref,
                       *, l_total, l_padded):
    l = pl.program_id(1)
    x = x_ref[0]            # (C_in_p, TL)  channels on sublanes, length on lanes
    hl = hl_ref[0, l]       # (C_in_p, 1)   column x[:, l*TL - 1] (0 at left edge)
    hr = hr_ref[0, l]       # (C_in_p, 1)   column x[:, (l+1)*TL] (0 at right edge)
    cin, tl = x.shape

    lane = jax.lax.broadcasted_iota(jnp.int32, (cin, tl), 1)
    # Shifted views x[j-1] / x[j+1]: lane rotation (XLU) + halo fix at tile edges.
    x_m1 = jnp.where(lane == 0, hl, pltpu.roll(x, shift=1, axis=1))
    x_p1 = jnp.where(lane == tl - 1, hr, pltpu.roll(x, shift=tl - 1, axis=1))

    # Fold the 3 taps into the contraction dim: one (C_out,3*C_in)@(3*C_in,TL).
    xs = jnp.concatenate([x_m1, x, x_p1], axis=0)                 # (3*C_in_p, TL)
    acc = jnp.dot(w_ref[...], xs, preferred_element_type=jnp.float32)  # f32

    y_ref[0] = acc.astype(y_ref.dtype)

    # Streaming BatchNorm statistics, accumulated into a VMEM-resident block.
    @pl.when(l == 0)
    def _init():
        ps_ref[...] = jnp.zeros_like(ps_ref)

    def _accum(a):
        s1 = jnp.sum(a, axis=1, keepdims=True)
        s2 = jnp.sum(a * a, axis=1, keepdims=True)
        ps_ref[0] += jnp.concatenate([s1, s2], axis=1)            # (C_out, 2)

    if l_total < l_padded:
        last = l_padded // tl - 1          # Python constants
        tail = l_total - last * tl
        # Only the last tile contains alignment-padding columns; mask only there.
        @pl.when(l == last)
        def _masked():
            col = jax.lax.broadcasted_iota(jnp.int32, acc.shape, 1)
            _accum(jnp.where(col < tail, acc, 0.0))

        @pl.when(l != last)
        def _plain():
            _accum(acc)
    else:
        _accum(acc)


# -----------------------------------------------------------------------------
# Pass 2 kernel: y * scale[c] + shift[c]  (scale/shift hoisted per channel).
# -----------------------------------------------------------------------------
def _bn_apply_kernel(scale_ref, shift_ref, y_ref, o_ref):
    y = y_ref[0].astype(jnp.float32)
    o_ref[0] = (y * scale_ref[...] + shift_ref[...]).astype(o_ref.dtype)


# -----------------------------------------------------------------------------
# Wrapper.
# -----------------------------------------------------------------------------
def double_conv_forward(x, w, b, gamma, beta, *, eps=1e-5, tile_l=4096,
                        compute_dtype=jnp.bfloat16, interpret=False):
    """Conv1d(k=3, pad=1) -> BatchNorm1d (training-mode batch stats), NCL layout.

    x: (N, C_in, L); w: (C_out, C_in, 3); b, gamma, beta: (C_out,)
    Note: the conv bias `b` cancels exactly in training-mode BN and is unused.
    """
    N, C_in, L = x.shape
    C_out = w.shape[0]
    out_dtype = x.dtype
    cdt = jnp.dtype(compute_dtype)
    cb = cdt.itemsize
    ob = jnp.dtype(out_dtype).itemsize

    # Pad the input-channel (sublane) dim to the sublane tile of the compute
    # dtype (8 for f32, 16 for bf16) so the in-kernel stack of the 3 shifted
    # views stays tile-aligned.
    sub = 8 * max(1, 4 // cb)
    C_in_p = ((C_in + sub - 1) // sub) * sub

    # ---- per-generation compiler knobs / VMEM budget. ------------------------
    kind = jax.devices()[0].device_kind.lower()
    if "v7" in kind:
        vmem_limit = 48 * 1024 * 1024        # v7x: 64 MiB physical per TC
    elif ("v5" in kind) or ("v6" in kind):
        vmem_limit = 100 * 1024 * 1024       # 128 MiB physical
    else:
        vmem_limit = None                    # stay at the backend default
    budget = vmem_limit if vmem_limit is not None else 16 * 1024 * 1024

    # ---- length (lane) tiling: L stays innermost and lane-dense. -------------
    tile_l = max(128, (int(tile_l) // 128) * 128)
    per_col = 2 * (C_in_p * cb + C_out * cb)        # double-buffered x + y_conv bytes/column
    max_tl = max(128, int((budget // 2) // per_col) // 128 * 128)
    tl_target = min(tile_l, max_tl)
    if L <= tl_target:
        TL, L_pad, GL = L, L, 1
    else:
        TL = tl_target
        GL = -(-L // TL)
        L_pad = GL * TL

    x_p = x
    if C_in_p != C_in:
        x_p = jnp.pad(x_p, ((0, 0), (0, C_in_p - C_in), (0, 0)))
        w = jnp.pad(w, ((0, 0), (0, C_in_p - C_in), (0, 0)))
    if L_pad != L:
        x_p = jnp.pad(x_p, ((0, 0), (0, 0), (0, L_pad - L)))
    x_p = x_p.astype(cdt)

    # Taps folded into the contraction dim: w2[o, t*C_in_p + i] = w[o, i, t].
    w2 = jnp.transpose(w, (0, 2, 1)).reshape(C_out, 3 * C_in_p).astype(cdt)

    # Per-tile halo columns, kept VMEM-resident for a whole batch row.
    if GL == 1:
        hl = jnp.zeros((N, 1, C_in_p, 1), cdt)
        hr = jnp.zeros((N, 1, C_in_p, 1), cdt)
    else:
        zero_col = jnp.zeros((N, C_in_p, 1), cdt)
        left_src = x_p[:, :, TL - 1::TL]            # last column of each tile
        right_src = x_p[:, :, 0::TL]                # first column of each tile
        hl = jnp.concatenate([zero_col, left_src[:, :, :GL - 1]], axis=2)
        hr = jnp.concatenate([right_src[:, :, 1:], zero_col], axis=2)
        hl = jnp.transpose(hl, (0, 2, 1))[..., None]   # (N, GL, C_in_p, 1)
        hr = jnp.transpose(hr, (0, 2, 1))[..., None]   # (N, GL, C_in_p, 1)

    cp1 = dict(dimension_semantics=("parallel", "arbitrary"))
    cp2 = dict(dimension_semantics=("parallel", "parallel"))
    if vmem_limit is not None:
        cp1["vmem_limit_bytes"] = vmem_limit
        cp2["vmem_limit_bytes"] = vmem_limit

    cost1 = pl.CostEstimate(
        flops=2 * N * L_pad * C_out * 3 * C_in_p,
        transcendentals=0,
        bytes_accessed=(N * C_in_p * L_pad * cb
                        + C_out * 3 * C_in_p * cb
                        + 2 * N * GL * C_in_p * cb
                        + N * C_out * L_pad * cb
                        + N * C_out * 2 * 4),
    )

    conv_kernel = functools.partial(_conv_stats_kernel, l_total=L, l_padded=L_pad)

    y_conv, pstats = pl.pallas_call(
        conv_kernel,
        grid=(N, GL),
        in_specs=[
            pl.BlockSpec((1, C_in_p, TL), lambda n, l: (n, 0, l)),
            pl.BlockSpec((1, GL, C_in_p, 1), lambda n, l: (n, 0, 0, 0)),  # resident halos
            pl.BlockSpec((1, GL, C_in_p, 1), lambda n, l: (n, 0, 0, 0)),  # resident halos
            pl.BlockSpec((C_out, 3 * C_in_p), lambda n, l: (0, 0)),       # resident weight
        ],
        out_specs=[
            pl.BlockSpec((1, C_out, TL), lambda n, l: (n, 0, l)),
            pl.BlockSpec((1, C_out, 2), lambda n, l: (n, 0, 0)),          # resident stats acc
        ],
        out_shape=[
            jax.ShapeDtypeStruct((N, C_out, L_pad), cdt),                 # bf16 intermediate
            jax.ShapeDtypeStruct((N, C_out, 2), jnp.float32),
        ],
        compiler_params=pltpu.CompilerParams(**cp1),
        cost_estimate=cost1,
        interpret=interpret,
    )(x_p, hl, hr, w2)

    # ---- combine streaming stats; hoist per-channel scale / shift (tiny). ----
    cnt = float(N * L)
    s = jnp.sum(pstats, axis=0)                          # (C_out, 2) f32
    mean = s[:, 0] / cnt
    var = jnp.maximum(s[:, 1] / cnt - mean * mean, 0.0)  # biased var (train-mode BN)
    inv = jax.lax.rsqrt(var + eps)
    g32 = gamma.astype(jnp.float32)
    scale = (g32 * inv).reshape(C_out, 1)
    # Conv bias cancels exactly: (conv+b) - mean(conv+b) = conv - mean(conv).
    shift = (beta.astype(jnp.float32) - mean * g32 * inv).reshape(C_out, 1)
    # TODO(synk): running_mean / running_var buffer updates (training-time side
    # effect of nn.BatchNorm1d; running_var is the unbiased estimator) are not
    # emitted; only the forward output is.

    # ---- pass 2: pure streaming; its own (larger) tile that divides L_pad. ---
    per_col2 = 2 * C_out * (cb + ob)
    max_tl2 = max(TL, int((budget // 2) // max(per_col2, 1)))
    k = 1
    for cand in range(GL, 0, -1):
        if GL % cand == 0 and TL * cand <= max_tl2:
            k = cand
            break
    TL2, GL2 = TL * k, GL // k

    y = pl.pallas_call(
        _bn_apply_kernel,
        grid=(N, GL2),
        in_specs=[
            pl.BlockSpec((C_out, 1), lambda n, l: (0, 0)),
            pl.BlockSpec((C_out, 1), lambda n, l: (0, 0)),
            pl.BlockSpec((1, C_out, TL2), lambda n, l: (n, 0, l)),
        ],
        out_specs=pl.BlockSpec((1, C_out, TL2), lambda n, l: (n, 0, l)),
        out_shape=jax.ShapeDtypeStruct((N, C_out, L_pad), out_dtype),
        input_output_aliases=({2: 0} if cdt == jnp.dtype(out_dtype) else {}),
        compiler_params=pltpu.CompilerParams(**cp2),
        interpret=interpret,
    )(scale, shift, y_conv)

    return y[:, :, :L] if L_pad != L else y


# -----------------------------------------------------------------------------
# Pure-JAX reference (PyTorch Conv1d + training-mode BatchNorm1d semantics).
# -----------------------------------------------------------------------------
def _reference(x, w, b, gamma, beta, eps=1e-5):
    N, C_in, L = x.shape
    xp = jnp.pad(x.astype(jnp.float32), ((0, 0), (0, 0), (1, 1)))
    y = jnp.zeros((N, w.shape[0], L), jnp.float32) + b[None, :, None]
    for t in range(3):
        y = y + jnp.einsum("oi,nil->nol", w[:, :, t].astype(jnp.float32),
                           xp[:, :, t:t + L],
                           precision=jax.lax.Precision.HIGHEST)
    mean = jnp.mean(y, axis=(0, 2), keepdims=True)
    var = jnp.mean(jnp.square(y - mean), axis=(0, 2), keepdims=True)
    return ((y - mean) * jax.lax.rsqrt(var + eps) * gamma[None, :, None]
            + beta[None, :, None])


def _run_case(key, N, C_in, C_out, L, rtol, atol, **kwargs):
    ks = jax.random.split(key, 5)
    x = jax.random.normal(ks[0], (N, C_in, L), jnp.float32)
    w = jax.random.normal(ks[1], (C_out, C_in, 3), jnp.float32) / math.sqrt(3 * C_in)
    b = 0.1 * jax.random.normal(ks[2], (C_out,), jnp.float32)
    gamma = 1.0 + 0.1 * jax.random.normal(ks[3], (C_out,), jnp.float32)
    beta = 0.1 * jax.random.normal(ks[4], (C_out,), jnp.float32)

    y = jax.block_until_ready(double_conv_forward(x, w, b, gamma, beta, **kwargs))
    y_ref = _reference(x, w, b, gamma, beta)
    np.testing.assert_allclose(np.asarray(y, dtype=np.float32), np.asarray(y_ref),
                               rtol=rtol, atol=atol)
    return y


if __name__ == "__main__":
    root = jax.random.PRNGKey(0)
    k_a, k_b, k_c = jax.random.split(root, 3)
    # Small shape consistent with the module: x = (batch, in_channels, length).
    # f32 compute path (tight numerical check of the conv + BN algebra).
    _run_case(k_a, N=2, C_in=4, C_out=8, L=16, rtol=5e-3, atol=5e-3,
              compute_dtype=jnp.float32)
    # Length-tiled path (TL=256, 3 tiles, ragged tail, resident stats
    # accumulation, pass-2 with a larger merged tile), default bf16 streams.
    _run_case(k_b, N=2, C_in=8, C_out=16, L=600, rtol=2e-2, atol=2e-2, tile_l=256)
    # Non-aligned channel counts (sublane-padding path), default bf16 streams.
    _run_case(k_c, N=2, C_in=3, C_out=10, L=40, rtol=2e-2, atol=2e-2)
    print("KERNEL_OK")
</pallas_src>

<mosaic_0001>
module attributes {stable_mosaic.version = 11 : i64} {
  func.func @_conv_stats_kernel(%arg0: i32, %arg1: i32, %arg2: memref<1x8x16xf32, #tpu.memory_space<vmem>>, %arg3: memref<1x1x8x1xf32, #tpu.memory_space<vmem>>, %arg4: memref<1x1x8x1xf32, #tpu.memory_space<vmem>>, %arg5: memref<8x24xf32, #tpu.memory_space<vmem>>, %arg6: memref<1x8x16xf32, #tpu.memory_space<vmem>>, %arg7: memref<1x8x2xf32, #tpu.memory_space<vmem>>) attributes {dimension_semantics = [#tpu.dimension_semantics<parallel>, #tpu.dimension_semantics<arbitrary>], iteration_bounds = array<i64: 2, 1>, scalar_prefetch = 0 : i64, scratch_operands = 0 : i64, tpu.core_type = #tpu.core_type<tc>, window_params = [{transform_indices = @transform_0, window_bounds = array<i64: 1, 8, 16>}, {transform_indices = @transform_1, window_bounds = array<i64: 1, 1, 8, 1>}, {transform_indices = @transform_2, window_bounds = array<i64: 1, 1, 8, 1>}, {pipeline_mode = #tpu.pipeline_mode<synchronous>, transform_indices = @transform_3, window_bounds = array<i64: 8, 24>}, {transform_indices = @transform_4, window_bounds = array<i64: 1, 8, 16>}, {transform_indices = @transform_5, window_bounds = array<i64: 1, 8, 2>}]} {
    %c0 = arith.constant 0 : index
    %c0_0 = arith.constant 0 : index
    %c0_1 = arith.constant 0 : index
    %0 = vector.load %arg2[%c0, %c0_0, %c0_1] : memref<1x8x16xf32, #tpu.memory_space<vmem>>, vector<1x8x16xf32>
    %1 = vector.shape_cast %0 : vector<1x8x16xf32> to vector<8x16xf32>
    %c0_2 = arith.constant 0 : index
    %2 = arith.index_cast %arg1 : i32 to index
    %c0_3 = arith.constant 0 : index
    %c0_4 = arith.constant 0 : index
    %3 = vector.load %arg3[%c0_2, %2, %c0_3, %c0_4] : memref<1x1x8x1xf32, #tpu.memory_space<vmem>>, vector<1x1x8x1xf32>
    %4 = vector.shape_cast %3 : vector<1x1x8x1xf32> to vector<8x1xf32>
    %c0_5 = arith.constant 0 : index
    %5 = arith.index_cast %arg1 : i32 to index
    %c0_6 = arith.constant 0 : index
    %c0_7 = arith.constant 0 : index
    %6 = vector.load %arg4[%c0_5, %5, %c0_6, %c0_7] : memref<1x1x8x1xf32, #tpu.memory_space<vmem>>, vector<1x1x8x1xf32>
    %7 = vector.shape_cast %6 : vector<1x1x8x1xf32> to vector<8x1xf32>
    %8 = tpu.iota {dimensions = array<i32: 1>} : vector<8x16xi32>
    %c0_i32 = arith.constant 0 : i32
    %9 = vector.broadcast %c0_i32 : i32 to vector<8x16xi32>
    %10 = arith.cmpi eq, %8, %9 : vector<8x16xi32>
    %c1_i32 = arith.constant 1 : i32
    %11 = tpu.dynamic_rotate %1 by %c1_i32 dim 1 : vector<8x16xf32>, i32 -> vector<8x16xf32>
    %12 = vector.shape_cast %4 : vector<8x1xf32> to vector<8x1xf32>
    %13 = vector.broadcast %12 : vector<8x1xf32> to vector<8x16xf32>
    %14 = arith.select %10, %13, %11 : vector<8x16xi1>, vector<8x16xf32>
    %c15_i32 = arith.constant 15 : i32
    %15 = vector.broadcast %c15_i32 : i32 to vector<8x16xi32>
    %16 = arith.cmpi eq, %8, %15 : vector<8x16xi32>
    %c15_i32_8 = arith.constant 15 : i32
    %17 = tpu.dynamic_rotate %1 by %c15_i32_8 dim 1 : vector<8x16xf32>, i32 -> vector<8x16xf32>
    %18 = vector.shape_cast %7 : vector<8x1xf32> to vector<8x1xf32>
    %19 = vector.broadcast %18 : vector<8x1xf32> to vector<8x16xf32>
    %20 = arith.select %16, %19, %17 : vector<8x16xi1>, vector<8x16xf32>
    %21 = tpu.concatenate %14, %1, %20 in 0 : vector<8x16xf32>, vector<8x16xf32>, vector<8x16xf32> -> vector<24x16xf32>
    %c0_9 = arith.constant 0 : index
    %c0_10 = arith.constant 0 : index
    %22 = vector.load %arg5[%c0_9, %c0_10] : memref<8x24xf32, #tpu.memory_space<vmem>>, vector<8x24xf32>
    %cst = arith.constant dense<0.000000e+00> : vector<8x16xf32>
    %23 = tpu.matmul %22, %21, %cst {dimension_numbers = #tpu.dot_dimension_numbers<[1], [0], [0], [1], [0, 0, 1, 1], [], []>} : vector<8x24xf32>, vector<24x16xf32>, vector<8x16xf32> -> vector<8x16xf32>
    %c0_11 = arith.constant 0 : index
    %c0_12 = arith.constant 0 : index
    %c0_13 = arith.constant 0 : index
    %24 = vector.load %arg6[%c0_11, %c0_12, %c0_13] : memref<1x8x16xf32, #tpu.memory_space<vmem>>, vector<1x8x16xf32>
    %25 = vector.shape_cast %24 : vector<1x8x16xf32> to vector<8x16xf32>
    %26 = vector.shape_cast %23 : vector<8x16xf32> to vector<1x8x16xf32>
    tpu.vector_store %arg6[%c0_11, %c0_12, %c0_13], %26 {strides = array<i32>} : memref<1x8x16xf32, #tpu.memory_space<vmem>>, vector<1x8x16xf32>,
    %c0_i32_14 = arith.constant 0 : i32
    %27 = arith.cmpi eq, %arg1, %c0_i32_14 : i32
    %28 = arith.extui %27 : i1 to i32
    %c0_i32_15 = arith.constant 0 : i32
    %29 = arith.cmpi ne, %28, %c0_i32_15 : i32
    scf.if %29 {
      %cst_24 = arith.constant 0.000000e+00 : f32
      %42 = vector.broadcast %cst_24 : f32 to vector<1x8x2xf32>
      %c0_25 = arith.constant 0 : index
      %c0_26 = arith.constant 0 : index
      %c0_27 = arith.constant 0 : index
      %43 = vector.load %arg7[%c0_25, %c0_26, %c0_27] : memref<1x8x2xf32, #tpu.memory_space<vmem>>, vector<1x8x2xf32>
      tpu.vector_store %arg7[%c0_25, %c0_26, %c0_27], %42 {strides = array<i32>} : memref<1x8x2xf32, #tpu.memory_space<vmem>>, vector<1x8x2xf32>,
    } else {
    }
    %cst_16 = arith.constant dense<0.000000e+00> : vector<8xf32>
    %30 = vector.multi_reduction <add>, %23, %cst_16 [1] : vector<8x16xf32> to vector<8xf32>
    %31 = vector.shape_cast %30 : vector<8xf32> to vector<8x1xf32>
    %32 = arith.mulf %23, %23 : vector<8x16xf32>
    %cst_17 = arith.constant dense<0.000000e+00> : vector<8xf32>
    %33 = vector.multi_reduction <add>, %32, %cst_17 [1] : vector<8x16xf32> to vector<8xf32>
    %34 = vector.shape_cast %33 : vector<8xf32> to vector<8x1xf32>
    %c0_18 = arith.constant 0 : index
    %c0_19 = arith.constant 0 : index
    %c0_20 = arith.constant 0 : index
    %35 = vector.load %arg7[%c0_18, %c0_19, %c0_20] : memref<1x8x2xf32, #tpu.memory_space<vmem>>, vector<1x8x2xf32>
    %36 = vector.shape_cast %35 : vector<1x8x2xf32> to vector<8x2xf32>
    %37 = tpu.concatenate %31, %34 in 1 : vector<8x1xf32>, vector<8x1xf32> -> vector<8x2xf32>
    %38 = arith.addf %36, %37 : vector<8x2xf32>
    %c0_21 = arith.constant 0 : index
    %c0_22 = arith.constant 0 : index
    %c0_23 = arith.constant 0 : index
    %39 = vector.load %arg7[%c0_21, %c0_22, %c0_23] : memref<1x8x2xf32, #tpu.memory_space<vmem>>, vector<1x8x2xf32>
    %40 = vector.shape_cast %39 : vector<1x8x2xf32> to vector<8x2xf32>
    %41 = vector.shape_cast %38 : vector<8x2xf32> to vector<1x8x2xf32>
    tpu.vector_store %arg7[%c0_21, %c0_22, %c0_23], %41 {strides = array<i32>} : memref<1x8x2xf32, #tpu.memory_space<vmem>>, vector<1x8x2xf32>,
    return
  }
  func.func @transform_0(%arg0: i32, %arg1: i32) -> (i32, i32, i32) {
    %c0_i32 = arith.constant 0 : i32
    %c0_i32_0 = arith.constant 0 : i32
    return %arg0, %c0_i32, %arg1 : i32, i32, i32
  }
  func.func @transform_1(%arg0: i32, %arg1: i32) -> (i32, i32, i32, i32) {
    %c0_i32 = arith.constant 0 : i32
    %c0_i32_0 = arith.constant 0 : i32
    %c0_i32_1 = arith.constant 0 : i32
    %c0_i32_2 = arith.constant 0 : i32
    return %arg0, %c0_i32, %c0_i32_0, %c0_i32_1 : i32, i32, i32, i32
  }
  func.func @transform_2(%arg0: i32, %arg1: i32) -> (i32, i32, i32, i32) {
    %c0_i32 = arith.constant 0 : i32
    %c0_i32_0 = arith.constant 0 : i32
    %c0_i32_1 = arith.constant 0 : i32
    %c0_i32_2 = arith.constant 0 : i32
    return %arg0, %c0_i32, %c0_i32_0, %c0_i32_1 : i32, i32, i32, i32
  }
  func.func @transform_3(%arg0: i32, %arg1: i32) -> (i32, i32) {
    %c0_i32 = arith.constant 0 : i32
    %c0_i32_0 = arith.constant 0 : i32
    %c0_i32_1 = arith.constant 0 : i32
    return %c0_i32, %c0_i32_0 : i32, i32
  }
  func.func @transform_4(%arg0: i32, %arg1: i32) -> (i32, i32, i32) {
    %c0_i32 = arith.constant 0 : i32
    %c0_i32_0 = arith.constant 0 : i32
    return %arg0, %c0_i32, %arg1 : i32, i32, i32
  }
  func.func @transform_5(%arg0: i32, %arg1: i32) -> (i32, i32, i32) {
    %c0_i32 = arith.constant 0 : i32
    %c0_i32_0 = arith.constant 0 : i32
    %c0_i32_1 = arith.constant 0 : i32
    return %arg0, %c0_i32, %c0_i32_0 : i32, i32, i32
  }
}

</mosaic_0001>

<bundles_post_ra>
// kernel: tpu_custom_call.1
= control target key start
LH: loop header
LB: loop body
LE: loop exit
PB: predicated region body
PF: predicated region fallthrough
CT: control target
= control target key end

     0   :  { %11 = vsyncpa [#allocation3], 0  ;;  %s905_s0 = inlined_call_operand.vmem [shape: f32[2,8,16], index: 0, kind: input, shape index: {}]   ;;  %s906_s1 = inlined_call_operand.vmem [shape: f32[2,1,8,1], index: 1, kind: input, shape index: {}]   ;;  %s907_s2 = inlined_call_operand.vmem [shape: f32[2,1,8,1], index: 2, kind: input, shape index: {}]   ;;  %s908_s3 = inlined_call_operand.vmem [shape: f32[8,24], index: 3, kind: input, shape index: {}]   ;;  %s909_s4 = inlined_call_operand.hbm [shape: f32[2,8,16], index: 4, kind: output, shape index: {0}]   ;;  %s910_s5 = inlined_call_operand.vmem [shape: f32[2,8,2], index: 5, kind: output, shape index: {1}]  }
   0x1   :  { %13 = vsyncpa [#allocation3 + $0x1], 0  ;;  %s780_s18 = smov 0   ;;  %s782_s19 = smov 0  }
   0x2   :  { %s784_s20 = smov 0   ;;  %s786_s21 = smov 0  }
   0x3   :  { %s788_s22 = smov 0   ;;  %s790_s23 = smov 0  }
   0x4 LB: > { %s567_s24 = sadd.s32 4294967295, %s740_s23   ;;  %s568_s25 = sadd.s32 4294967294, %s740_s23   ;;  %s740_s23 = sphi %s790_s23, %s19_s23   ;;  %s736_s22 = sphi %s788_s22, %s917_s22   ;;  %s732_s21 = sphi %s786_s21, %s916_s21   ;;  %s728_s20 = sphi %s784_s20, %s915_s20   ;;  %s724_s19 = sphi %s782_s19, %s914_s19   ;;  %s720_s18 = sphi %s780_s18, %s913_s18  }
   0x5   : > { %s31_s26 = sadd.s32 1, %s736_s22  ;;  %s141_s27 = sadd.s32 1, %s728_s20 }
   0x6   : > { %p33_p0 = scmp.ge.s32.totalorder %s31_s26, 2  ;;  %p151_p1 = scmp.ne.s32.totalorder %s728_s20, %s724_s19 }
   0x7   : > { %p152_p2 = scmp.eq.s32.totalorder %s567_s24, 1  ;;  %p157_p3 = scmp.ne.s32.totalorder %s724_s19, %s720_s18 }
   0x8   : > { %s919_s26 = smov (%p33_p0, %s31_s26), 0  ;;  %p158_p5 = scmp.eq.s32.totalorder %s568_s25, 1 }
   0x9   : > { %p820_p4 = por %p152_p2, %p151_p1  ;;  %s136_s29 = ssub.s32 %s736_s22, %s919_s26 }
   0xa   : > { %p571_p6 = scmp.ge.s32.totalorder %s740_s23, 1  ;;  %p139_p7 = scmp.eq.s32.totalorder %s136_s29, 0 }
   0xb   : > { %p827_p8 = por %p158_p5, %p157_p3  ;;  %p229_p9 = scmp.lt.s32.totalorder %s740_s23, 3 }
   0xc   : > { %s833_s6 = scalar_select %p139_p7, %s728_s20, %s141_s27  }
   0xd   : > { %p230_p10 = pnand %p571_p6, %p229_p9 }
   0xe   : > { %p271_p11 = scmp.lt.s32.totalorder (!%p230_p10), %s732_s21, 1  ;;  %v742_v0 = vmov (!%p230_p10), 0   ;;  %s743_s24 = smov (!%p230_p10), 16   ;;  %vm299_vm0 = vcmask (!%p230_p10), 1047680   ;;  %v744_v6 = vmov (!%p230_p10), 0.0|0.0   ;;  %vm407_vm1 = vcmask (!%p230_p10), 15360  }
   0xf   : > { %233 = sbr.rel (%p230_p10) target bundleno = 743 (0x2e7), region = 36  ;;  %660 = vset.pattern.permute.xlu1 (!%p230_p10), %v742_v0  ;;  %661 = vset.pattern.permute.xlu0 (!%p230_p10), %v742_v0  ;;  %v745_v7 = vmov (!%p230_p10), 0.0   ;;  %vm746_vm2 = vmmov (!%p230_p10), 0   ;;  %s748_s9 = smov (!%p230_p10), 113   ;;  %v296_v10 = vlaneseq (!%p230_p10)  ;;  %v326_v18 = vld [vmem:[%s908_s3] sm:$0xff] (!%p230_p10)  ;;  %vm327_vm5 = vcmask (!%p230_p10), 195584  }
  0x10   : > { %595 = vmatprep.subr.bf16.mxu0 (!%p230_p10), %v744_v6  ;;  %592 = vmatprep.mubr.msk.f32.mxu0 (!%p230_p10), %vm746_vm2, %v745_v7  ;;  %vm401_vm6 = vcmask (!%p230_p10), 130048  }
  0x11   : > { %v297_v12 = vand.u32 (!%p230_p10), 127, %v296_v10 }
  0x13   : > { %vm298_vm3 = vcmp.eq.s32.totalorder (!%p230_p10), %v297_v12, 0  ;;  %vm316_vm4 = vcmp.eq.s32.totalorder (!%p230_p10), %v297_v12, 15 }
  0x16   : > { %s272_s7 = scalar_select %p271_p11, %s732_s21, 1 }
  0x18   : > { %s573_s8 = sshll.u32 %s272_s7, 3  ;;  %s747_s7 = smov 127  }
  0x19   : > { %s277_s11 = scalar_lea.vmem %s905_s0, %s573_s8  ;;  %s281_s14 = scalar_lea.vmem %s906_s1, %s573_s8 }
  0x1a   : > { %v290_v1 = vld [vmem:[%s277_s11] sm:$0xff]  ;;  %s285_s17 = scalar_lea.vmem %s907_s2, %s573_s8  ;;  %s849_s29 = scalar_lea.vmem %s910_s5, %s573_s8 }
  0x1b   : > { %v293_v2 = vld [vmem:[%s281_s14] sm:$0xff]  ;;  %300 = vrot.lane.b32.xlu0 %v290_v1, %s743_s24  ;;  %408 = vst.msk [vmem:[%s849_s29] sm:$0xff] %vm407_vm1, %v745_v7  ;;  %s262_s11 = sand.u32 1, %s724_s19   ;;  %s579_s14 = sshll.u32 %s732_s21, 7 }
  0x1c   : > { %308 = vperm.xlu1 %660, %v293_v2   ;;  %v295_v3 = vld [vmem:[%s285_s17] sm:$0xff]  ;;  %s572_s12 = sshll.u32 %s262_s11, 3  ;;  %s423_s25 = scalar_lea.sflag [#allocation3], %s262_s11 }
  0x1d   : > { %s264_s13 = scalar_lea.vmem [#allocation2], %s572_s12 }
  0x1e   : > { %s441_s15 = sshll.u32 %s264_s13, 4  ;;  %s442_s15 = int_to_ptr.vmem [resolvable:$true] %s441_s15 }
  0x1f   : > { %s662_s27 = scalar_lea.vmem %s442_s15, 128 }
  0x20   : > { %319 = vperm.xlu1 %660, %v295_v3   ;;  %p663_p12 = scmp.ne.s32.totalorder %s442_s15, %s662_s27 }
  0x22   : > { %p664_p13 = pnand %p663_p12, %p820_p4 }
  0x24   : > { %p665_p0 = pneg %p664_p13 }
  0x8d   : > { %v301_v4 = vpop.permute.xlu0 %300 }
  0x8e   : > { %v302_v5 = vsel %vm299_vm0, %v301_v4, %v290_v1 }
  0x8f   : > { %303 = vrot.lane.b32.xlu0 %v302_v5, %s743_s24  ;;  %s861_s24 = scalar_lea.hbm %s909_s4, %s579_s14 }
  0x9b   : > { %v309_v11 = vpop.permute.xlu1 %308 }
  0x9f   : > { %v320_v13 = vpop.permute.xlu1 %319 }
 0x101   : > { %v304_v8 = vpop.permute.xlu0 %303 }
 0x102   : > { %v305_v9 = vsel %vm299_vm0, %v304_v8, %v290_v1 }
 0x103   : > { %322 = vrot.lane.b32.xlu1 %v305_v9, %s747_s7  ;;  %312 = vrot.lane.b32.xlu0 %v305_v9, %s748_s9  ;;  %s749_s7 = smov [#allocation2]  }
 0x104   : > { %s666_s9 = sshll.u32 %s749_s7, 4  ;;  %s667_s9 = int_to_ptr.vmem [resolvable:$false] %s666_s9 }
 0x105   : > { %s668_s8 = scalar_lea.vmem %s667_s9, 256  ;;  %p669_p1 = scmp.lt.s32.totalorder %s442_s15, %s667_s9 }
 0x106   : > { %p670_p2 = scmp.lt.s32.totalorder %s668_s8, %s662_s27 }
 0x108   : > { %p671_p3 = por %p670_p2, %p669_p1 }
 0x10a   : > { %p672_p5 = pnand %p671_p3, %p665_p0 }
 0x175   : > { %v313_v14 = vpop.permute.xlu0 %312  ;;  %v323_v17 = vpop.permute.xlu1 %322 }
 0x176   : > { %v315_v15 = vsel %vm298_vm3, %v309_v11, %v313_v14  ;;  %v325_v19 = vsel %vm316_vm4, %v320_v13, %v323_v17 }
 0x177   : > { %v596_v16 = vpack.c.bf16 %v290_v1, %v315_v15 }
 0x179   : > { %597 = vmatpush3.bf16.msra.mxu0 %v596_v16 }
 0x17a   : > { %590 = vmatprep.subr.mxu0 %v745_v7 }
 0x17d   : > { %591 = vmatpush3.msra.mxu0 %v325_v19 }
 0x17e   : > { %593 = vmatmul.mubr.msk.f32.vlgmr.msra.gmra.mrb[0].mxu0 %vm327_vm5, %v326_v18 }
 0x251   : > { %v397_v20 = vpop.f32.mrb[0].mxu0 }
 0x252   : > { %v594_v21 = vpop.f32.mrb[1].mxu0  ;;  %v409_v22 = vsel %vm401_vm6, %v397_v20, 0.0  ;;  %v412_v23 = vmul.f32 %v397_v20, %v397_v20  ;;  %402 = vst.msk [vmem:[%s264_s13] sm:$0xff] %vm401_vm6, %v397_v20 }
 0x253   : > { %410 = vadd.xlane.f32.xlu0 %v409_v22 }
 0x254   : > { %v413_v24 = vsel %vm401_vm6, %v412_v23, 0.0 }
 0x255   : > { %414 = vadd.xlane.f32.xlu1 %v413_v24 }
 0x256   : > { %675 = shalt.err (!%p672_p5)
}
 0x257   : > { %s676_s21 = scalar_lea.hbm %s861_s24, 128  ;;  %s680_s12 = scalar_lea.hbm %s909_s4, 256 }
 0x258   : > { %p677_p6 = scmp.ne.s32.totalorder %s861_s24, %s676_s21  ;;  %p681_p10 = scmp.lt.u32.totalorder %s861_s24, %s909_s4 }
 0x259   : > { %p682_p11 = scmp.lt.u32.totalorder %s680_s12, %s676_s21  ;;  %p684_p13 = scmp.lt.u32.totalorder %s676_s21, %s861_s24 }
 0x25a   : > { %p678_p7 = pnand %p677_p6, %p820_p4 }
 0x25b   : > { %p683_p12 = por %p682_p11, %p681_p10 }
 0x25c   : > { %p679_p9 = pneg %p678_p7 }
 0x25d   : > { %p685_p0 = por %p684_p13, %p683_p12 }
 0x25f   : > { %p686_p1 = pnand %p685_p0, %p679_p9 }
 0x261   : > { %689 = shalt.err (!%p686_p1)
}
 0x262   : > { %598 = dma.vmem_to_hbm [thread:$0]  (%p820_p4), %s442_s15, 128, %s861_s24, %s423_s25   ;;  %vm417_vm7 = vcmask 7168   ;;  %v416_v25 = vld [vmem:[%s849_s29] sm:$0xff] }
 0x2e0   : > { %v411_v26 = vpop.xlane.xlu0 %410 }
 0x2e2   : > { %v415_v27 = vpop.xlane.xlu1 %414 }
 0x2e3   : > { %v418_v28 = vsel %vm417_vm7, %v411_v26, %v415_v27 }
 0x2e4   : > { %v419_v29 = vadd.f32 %v418_v28, %v416_v25 }
 0x2e6   : > { %421 = vst.msk [vmem:[%s849_s29] sm:$0xff] %vm407_vm1, %v419_v29 }
 0x2e7 PF: > { %p604_p2 = scmp.ge.s32.totalorder %s740_s23, 2  ;;  %s456_s16 = sand.u32 1, %s720_s18  }
 0x2e8   : > { %s457_s28 = scalar_lea.sflag [#allocation3], %s456_s16 }
 0x2e9   : > { %p601_p3 = pnand %p604_p2, %p827_p8 }
 0x2eb   : > { %715 = dma.done.wait (!%p601_p3), %s457_s28, 128  }
 0x2ec   : > { %717 = vsyncadd (!%p601_p3), %s457_s28, 4294967168  ;;  %s19_s23 = sadd.s32 1, %s740_s23   ;;  %s913_s18 = smov %s724_s19 }
 0x2ed   : > { %p16_p4 = scmp.ge.s32.totalorder %s19_s23, 4   ;;  %s914_s19 = smov %s728_s20 }
 0x2ee   : > { %s915_s20 = smov %s833_s6  ;;  %s916_s21 = smov %s736_s22 }
 0x2ef   : > { %s917_s22 = smov %s919_s26  ;;  %18 = sbr.rel (!%p16_p4) target bundleno = 4 (0x4), region = 95 }
 0x2f6   :  { %469 = vsyncpa [#allocation3], 1 }
 0x2f7   :  { %471 = vsyncpa [#allocation3 + $0x1], 1 }

</bundles_post_ra>
